<compile_context>
chip_gen: v5e
topology: v5e:2x2
jax: 0.10.0
libtpu: 0.0.40
codegen_flags: <defaults>
</compile_context>

<pallas_src>
import jax
import jax.numpy as jnp
from jax.experimental import pallas as pl
from jax.experimental.pallas import tpu as pltpu

LANE = 128   # TPU lane width
SLOT = 128   # lane-aligned column slot inside the packed weight slab


def _pick_tile(hw_pad, target):
    """Largest multiple of 128 that divides hw_pad and is <= target."""
    q = hw_pad // LANE
    best = 1
    for d in range(1, q + 1):
        if q % d == 0 and d * LANE <= target:
            best = d
    return best * LANE


def _make_kernel(cin, cm, cout):
    def dag_kernel(x1_ref, x2_ref, w_ref, y1_ref, y2_ref):
        # Static, lane-aligned views into the packed weight slab (zero cost).
        w12t = w_ref[:cm, 0:2 * cin]                       # fused (Cm, 2*Cin)
        b12 = w_ref[:cm, 1 * SLOT:1 * SLOT + 1]            # (Cm, 1) = b1 + b2
        wmt = w_ref[:cm, 2 * SLOT:2 * SLOT + cm]           # (Cm, Cm)
        bm = w_ref[:cm, 3 * SLOT:3 * SLOT + 1]             # (Cm, 1)
        wot = w_ref[:2 * cout, 4 * SLOT:4 * SLOT + cm]     # fused heads (2Cout, Cm)
        bo = w_ref[:2 * cout, 5 * SLOT:5 * SLOT + 1]       # (2Cout, 1)

        # Stack x1/x2 on sublanes -> single K = 2*Cin MXU matmul
        # (input ops + merge_tensor(mode='add') in one shot).
        xcat = jnp.concatenate([x1_ref[...], x2_ref[...]], axis=0)   # (2Cin, tm)
        f = jnp.dot(w12t, xcat, preferred_element_type=jnp.float32) + b12
        feat = jnp.maximum(f, 0.0)                                   # post_input ReLU
        mid = jnp.maximum(                                           # middle conv + ReLU
            jnp.dot(wmt, feat, preferred_element_type=jnp.float32) + bm, 0.0)
        out = jnp.dot(wot, mid, preferred_element_type=jnp.float32) + bo
        y1_ref[...] = out[:cout, :].astype(y1_ref.dtype)
        y2_ref[...] = out[cout:2 * cout, :].astype(y2_ref.dtype)

    return dag_kernel


def dag_block_forward(feature_dict, params, *,
                      vmem_budget_bytes=24 * 1024 * 1024,
                      max_lanes=32768):
    """Runs the DAGBlock forward. feature_dict: {'x1': NCHW, 'x2': NCHW}."""
    x1 = feature_dict["x1"]
    x2 = feature_dict["x2"]
    N, Cin, H, W = x1.shape
    HW = H * W
    out_dtype = x1.dtype

    Cm = params["w1"].shape[1]
    Cout = params["wo1"].shape[1]
    assert 2 * Cin <= SLOT and Cm <= SLOT, "channel dims exceed one 128-lane slot"

    # ---- pack all (tiny) weights/biases once into ONE lane-aligned f32 slab ----
    w12t = jnp.concatenate([params["w1"].T, params["w2"].T], axis=1)   # (Cm, 2Cin)
    b12 = (params["b1"] + params["b2"]).T                              # (Cm, 1)
    wmt = params["wm"].T                                               # (Cm, Cm)
    bmT = params["bm"].T                                               # (Cm, 1)
    wot = jnp.concatenate([params["wo1"], params["wo2"]], axis=1).T    # (2Cout, Cm)
    boT = jnp.concatenate([params["bo1"], params["bo2"]], axis=1).T    # (2Cout, 1)

    R = ((max(Cm, 2 * Cout) + 7) // 8) * 8
    wslab = jnp.zeros((R, 6 * SLOT), jnp.float32)
    wslab = wslab.at[:Cm, 0:2 * Cin].set(w12t.astype(jnp.float32))
    wslab = wslab.at[:Cm, 1 * SLOT:1 * SLOT + 1].set(b12.astype(jnp.float32))
    wslab = wslab.at[:Cm, 2 * SLOT:2 * SLOT + Cm].set(wmt.astype(jnp.float32))
    wslab = wslab.at[:Cm, 3 * SLOT:3 * SLOT + 1].set(bmT.astype(jnp.float32))
    wslab = wslab.at[:2 * Cout, 4 * SLOT:4 * SLOT + Cm].set(wot.astype(jnp.float32))
    wslab = wslab.at[:2 * Cout, 5 * SLOT:5 * SLOT + 1].set(boT.astype(jnp.float32))

    # NCHW -> (N, C, H*W): free reshape, spatial axis on lanes.
    x1f = x1.reshape(N, Cin, HW)
    x2f = x2.reshape(N, Cin, HW)

    # Pad only to the next multiple of 128 (<=127 lanes).  When HW is already
    # 128-aligned (the common case) there is NO wrapper-side pad or slice copy.
    HW_pad = pl.cdiv(HW, LANE) * LANE
    if HW_pad != HW:
        pad = ((0, 0), (0, 0), (0, HW_pad - HW))
        x1f = jnp.pad(x1f, pad)
        x2f = jnp.pad(x2f, pad)

    # VMEM-budget-driven lane tile: double-buffered pipeline I/O + in-kernel temps.
    bytes_per_lane = 4 * (2 * (2 * Cin + 2 * Cout)            # x1,x2,y1,y2 (x2 buffers)
                          + (2 * Cin + 2 * Cm + 2 * Cout))    # xcat, feat, mid, out
    tm_target = max(LANE, min(max_lanes,
                              (vmem_budget_bytes // bytes_per_lane) // LANE * LANE))
    tm_eff = _pick_tile(HW_pad, tm_target)
    # Keep >=2 parallel grid steps so v7x's two TensorCores both get work.
    if N * (HW_pad // tm_eff) < 2 and HW_pad > LANE:
        tm_eff = _pick_tile(HW_pad, tm_eff // 2)

    grid = (N, HW_pad // tm_eff)

    x_spec = pl.BlockSpec((None, Cin, tm_eff), lambda n, m: (n, 0, m))
    y_spec = pl.BlockSpec((None, Cout, tm_eff), lambda n, m: (n, 0, m))
    w_spec = pl.BlockSpec(wslab.shape, lambda n, m: (0, 0))   # resident, fetched once

    elem = jnp.dtype(out_dtype).itemsize
    flops = 2 * N * HW_pad * (2 * Cin * Cm + Cm * Cm + Cm * 2 * Cout)
    bytes_accessed = elem * N * HW_pad * (2 * Cin + 2 * Cout) + 4 * wslab.size

    kernel = _make_kernel(Cin, Cm, Cout)

    y1, y2 = pl.pallas_call(
        kernel,
        out_shape=(jax.ShapeDtypeStruct((N, Cout, HW_pad), out_dtype),
                   jax.ShapeDtypeStruct((N, Cout, HW_pad), out_dtype)),
        grid_spec=pltpu.PrefetchScalarGridSpec(
            num_scalar_prefetch=0,
            grid=grid,
            in_specs=[x_spec, x_spec, w_spec],
            out_specs=[y_spec, y_spec],
        ),
        compiler_params=pltpu.CompilerParams(
            dimension_semantics=("parallel", "parallel"),
            vmem_limit_bytes=32 * 1024 * 1024),
        cost_estimate=pl.CostEstimate(
            flops=int(flops), transcendentals=0,
            bytes_accessed=int(bytes_accessed)),
    )(x1f, x2f, wslab)

    def to_nchw(y):
        if HW_pad != HW:
            y = y[:, :, :HW]     # only pays the copy when lane padding was needed
        return y.reshape(N, Cout, H, W)

    out_dict = dict(feature_dict)
    out_dict["y1"] = to_nchw(y1)
    out_dict["y2"] = to_nchw(y2)
    return out_dict


def reference_forward(feature_dict, params):
    """Pure-JAX reference of the same DAGBlock semantics (NCHW 1x1 convs)."""
    def conv1x1(x_nchw, w, b):  # w: (Cin, Cout), b: (1, Cout)
        N, C, H, W = x_nchw.shape
        xf = jnp.transpose(x_nchw, (0, 2, 3, 1)).reshape(-1, C)
        yf = xf @ w + b
        return jnp.transpose(yf.reshape(N, H, W, -1), (0, 3, 1, 2))

    f1 = conv1x1(feature_dict["x1"], params["w1"], params["b1"])
    f2 = conv1x1(feature_dict["x2"], params["w2"], params["b2"])
    feat = jnp.maximum(f1 + f2, 0.0)                      # merge 'add' + ReLU
    mid = jnp.maximum(conv1x1(feat, params["wm"], params["bm"]), 0.0)
    out = dict(feature_dict)
    out["y1"] = conv1x1(mid, params["wo1"], params["bo1"])
    out["y2"] = conv1x1(mid, params["wo2"], params["bo2"])
    return out


if __name__ == "__main__":
    key = jax.random.PRNGKey(0)
    N, Cin, H, W = 2, 4, 16, 16
    Cm, Cout = 32, 8

    keys = jax.random.split(key, 16)
    x1 = jax.random.normal(keys[0], (N, Cin, H, W), jnp.float32)
    x2 = jax.random.normal(keys[1], (N, Cin, H, W), jnp.float32)

    def mk(k, shape, scale=0.1):
        return scale * jax.random.normal(k, shape, jnp.float32)

    params = {
        "w1": mk(keys[2], (Cin, Cm)), "b1": mk(keys[3], (1, Cm)),
        "w2": mk(keys[4], (Cin, Cm)), "b2": mk(keys[5], (1, Cm)),
        "wm": mk(keys[6], (Cm, Cm)), "bm": mk(keys[7], (1, Cm)),
        "wo1": mk(keys[8], (Cm, Cout)), "bo1": mk(keys[9], (1, Cout)),
        "wo2": mk(keys[10], (Cm, Cout)), "bo2": mk(keys[11], (1, Cout)),
    }

    feature_dict = {"x1": x1, "x2": x2}

    out = dag_block_forward(feature_dict, params)
    jax.block_until_ready(out["y1"])
    jax.block_until_ready(out["y2"])

    ref = reference_forward(feature_dict, params)
    assert jnp.allclose(out["y1"], ref["y1"], atol=1e-4, rtol=1e-4)
    assert jnp.allclose(out["y2"], ref["y2"], atol=1e-4, rtol=1e-4)
    assert out["x1"].shape == (N, Cin, H, W)
    assert out["y1"].shape == (N, Cout, H, W)
    assert out["y2"].shape == (N, Cout, H, W)

    print("KERNEL_OK")
</pallas_src>

<mosaic_0001>
module attributes {stable_mosaic.version = 11 : i64} {
  func.func @dag_kernel(%arg0: i32, %arg1: i32, %arg2: memref<1x4x256xf32, #tpu.memory_space<vmem>>, %arg3: memref<1x4x256xf32, #tpu.memory_space<vmem>>, %arg4: memref<32x768xf32, #tpu.memory_space<vmem>>, %arg5: memref<1x8x256xf32, #tpu.memory_space<vmem>>, %arg6: memref<1x8x256xf32, #tpu.memory_space<vmem>>) attributes {dimension_semantics = [#tpu.dimension_semantics<parallel>, #tpu.dimension_semantics<parallel>], iteration_bounds = array<i64: 2, 1>, scalar_prefetch = 0 : i64, scratch_operands = 0 : i64, tpu.core_type = #tpu.core_type<tc>, window_params = [{transform_indices = @transform_0, window_bounds = array<i64: 1, 4, 256>}, {transform_indices = @transform_1, window_bounds = array<i64: 1, 4, 256>}, {pipeline_mode = #tpu.pipeline_mode<synchronous>, transform_indices = @transform_2, window_bounds = array<i64: 32, 768>}, {transform_indices = @transform_3, window_bounds = array<i64: 1, 8, 256>}, {transform_indices = @transform_4, window_bounds = array<i64: 1, 8, 256>}]} {
    %c0 = arith.constant 0 : index
    %c0_0 = arith.constant 0 : index
    %0 = vector.load %arg4[%c0, %c0_0] : memref<32x768xf32, #tpu.memory_space<vmem>>, vector<32x8xf32>
    %c0_1 = arith.constant 0 : index
    %c128 = arith.constant 128 : index
    %1 = vector.load %arg4[%c0_1, %c128] : memref<32x768xf32, #tpu.memory_space<vmem>>, vector<32x1xf32>
    %c0_2 = arith.constant 0 : index
    %c256 = arith.constant 256 : index
    %2 = vector.load %arg4[%c0_2, %c256] : memref<32x768xf32, #tpu.memory_space<vmem>>, vector<32x32xf32>
    %c0_3 = arith.constant 0 : index
    %c384 = arith.constant 384 : index
    %3 = vector.load %arg4[%c0_3, %c384] : memref<32x768xf32, #tpu.memory_space<vmem>>, vector<32x1xf32>
    %c0_4 = arith.constant 0 : index
    %c512 = arith.constant 512 : index
    %4 = vector.load %arg4[%c0_4, %c512] : memref<32x768xf32, #tpu.memory_space<vmem>>, vector<16x32xf32>
    %c0_5 = arith.constant 0 : index
    %c640 = arith.constant 640 : index
    %5 = vector.load %arg4[%c0_5, %c640] : memref<32x768xf32, #tpu.memory_space<vmem>>, vector<16x1xf32>
    %c0_6 = arith.constant 0 : index
    %c0_7 = arith.constant 0 : index
    %c0_8 = arith.constant 0 : index
    %6 = vector.load %arg2[%c0_6, %c0_7, %c0_8] : memref<1x4x256xf32, #tpu.memory_space<vmem>>, vector<1x4x256xf32>
    %7 = vector.shape_cast %6 : vector<1x4x256xf32> to vector<4x256xf32>
    %c0_9 = arith.constant 0 : index
    %c0_10 = arith.constant 0 : index
    %c0_11 = arith.constant 0 : index
    %8 = vector.load %arg3[%c0_9, %c0_10, %c0_11] : memref<1x4x256xf32, #tpu.memory_space<vmem>>, vector<1x4x256xf32>
    %9 = vector.shape_cast %8 : vector<1x4x256xf32> to vector<4x256xf32>
    %10 = tpu.concatenate %7, %9 in 0 : vector<4x256xf32>, vector<4x256xf32> -> vector<8x256xf32>
    %cst = arith.constant dense<0.000000e+00> : vector<32x256xf32>
    %11 = tpu.matmul %0, %10, %cst {dimension_numbers = #tpu.dot_dimension_numbers<[1], [0], [0], [1], [0, 0, 1, 1], [], []>} : vector<32x8xf32>, vector<8x256xf32>, vector<32x256xf32> -> vector<32x256xf32>
    %12 = vector.broadcast %1 : vector<32x1xf32> to vector<32x256xf32>
    %13 = arith.addf %11, %12 : vector<32x256xf32>
    %cst_12 = arith.constant 0.000000e+00 : f32
    %14 = vector.broadcast %cst_12 : f32 to vector<32x256xf32>
    %15 = arith.maximumf %13, %14 : vector<32x256xf32>
    %cst_13 = arith.constant dense<0.000000e+00> : vector<32x256xf32>
    %16 = tpu.matmul %2, %15, %cst_13 {dimension_numbers = #tpu.dot_dimension_numbers<[1], [0], [0], [1], [0, 0, 1, 1], [], []>} : vector<32x32xf32>, vector<32x256xf32>, vector<32x256xf32> -> vector<32x256xf32>
    %17 = vector.broadcast %3 : vector<32x1xf32> to vector<32x256xf32>
    %18 = arith.addf %16, %17 : vector<32x256xf32>
    %cst_14 = arith.constant 0.000000e+00 : f32
    %19 = vector.broadcast %cst_14 : f32 to vector<32x256xf32>
    %20 = arith.maximumf %18, %19 : vector<32x256xf32>
    %cst_15 = arith.constant dense<0.000000e+00> : vector<16x256xf32>
    %21 = tpu.matmul %4, %20, %cst_15 {dimension_numbers = #tpu.dot_dimension_numbers<[1], [0], [0], [1], [0, 0, 1, 1], [], []>} : vector<16x32xf32>, vector<32x256xf32>, vector<16x256xf32> -> vector<16x256xf32>
    %22 = vector.broadcast %5 : vector<16x1xf32> to vector<16x256xf32>
    %23 = arith.addf %21, %22 : vector<16x256xf32>
    %24 = vector.extract_strided_slice %23 {offsets = [0, 0], sizes = [8, 256], strides = [1, 1]} : vector<16x256xf32> to vector<8x256xf32>
    %c0_16 = arith.constant 0 : index
    %c0_17 = arith.constant 0 : index
    %c0_18 = arith.constant 0 : index
    %25 = vector.load %arg5[%c0_16, %c0_17, %c0_18] : memref<1x8x256xf32, #tpu.memory_space<vmem>>, vector<1x8x256xf32>
    %26 = vector.shape_cast %25 : vector<1x8x256xf32> to vector<8x256xf32>
    %27 = vector.shape_cast %24 : vector<8x256xf32> to vector<1x8x256xf32>
    tpu.vector_store %arg5[%c0_16, %c0_17, %c0_18], %27 {strides = array<i32>} : memref<1x8x256xf32, #tpu.memory_space<vmem>>, vector<1x8x256xf32>,
    %28 = vector.extract_strided_slice %23 {offsets = [8, 0], sizes = [8, 256], strides = [1, 1]} : vector<16x256xf32> to vector<8x256xf32>
    %c0_19 = arith.constant 0 : index
    %c0_20 = arith.constant 0 : index
    %c0_21 = arith.constant 0 : index
    %29 = vector.load %arg6[%c0_19, %c0_20, %c0_21] : memref<1x8x256xf32, #tpu.memory_space<vmem>>, vector<1x8x256xf32>
    %30 = vector.shape_cast %29 : vector<1x8x256xf32> to vector<8x256xf32>
    %31 = vector.shape_cast %28 : vector<8x256xf32> to vector<1x8x256xf32>
    tpu.vector_store %arg6[%c0_19, %c0_20, %c0_21], %31 {strides = array<i32>} : memref<1x8x256xf32, #tpu.memory_space<vmem>>, vector<1x8x256xf32>,
    return
  }
  func.func @transform_0(%arg0: i32, %arg1: i32) -> (i32, i32, i32) {
    %c0_i32 = arith.constant 0 : i32
    %c0_i32_0 = arith.constant 0 : i32
    return %arg0, %c0_i32, %arg1 : i32, i32, i32
  }
  func.func @transform_1(%arg0: i32, %arg1: i32) -> (i32, i32, i32) {
    %c0_i32 = arith.constant 0 : i32
    %c0_i32_0 = arith.constant 0 : i32
    return %arg0, %c0_i32, %arg1 : i32, i32, i32
  }
  func.func @transform_2(%arg0: i32, %arg1: i32) -> (i32, i32) {
    %c0_i32 = arith.constant 0 : i32
    %c0_i32_0 = arith.constant 0 : i32
    %c0_i32_1 = arith.constant 0 : i32
    return %c0_i32, %c0_i32_0 : i32, i32
  }
  func.func @transform_3(%arg0: i32, %arg1: i32) -> (i32, i32, i32) {
    %c0_i32 = arith.constant 0 : i32
    %c0_i32_0 = arith.constant 0 : i32
    return %arg0, %c0_i32, %arg1 : i32, i32, i32
  }
  func.func @transform_4(%arg0: i32, %arg1: i32) -> (i32, i32, i32) {
    %c0_i32 = arith.constant 0 : i32
    %c0_i32_0 = arith.constant 0 : i32
    return %arg0, %c0_i32, %arg1 : i32, i32, i32
  }
}

</mosaic_0001>

<bundles_post_ra>
// kernel: tpu_custom_call.1
= control target key start
LH: loop header
LB: loop body
LE: loop exit
PB: predicated region body
PF: predicated region fallthrough
CT: control target
= control target key end

     0   :  { %s1388_s0 = inlined_call_operand.hbm [shape: f32[2,4,256], index: 0, kind: input, shape index: {}]   ;;  %s1389_s1 = inlined_call_operand.hbm [shape: f32[2,4,256], index: 1, kind: input, shape index: {}]   ;;  %s1390_s2 = inlined_call_operand.hbm [shape: f32[32,768], index: 2, kind: input, shape index: {}]   ;;  %s1391_s3 = inlined_call_operand.hbm [shape: f32[2,8,256], index: 3, kind: output, shape index: {0}]   ;;  %s1392_s4 = inlined_call_operand.hbm [shape: f32[2,8,256], index: 4, kind: output, shape index: {1}]  }
   0x1   :  { %1396 = sst [smem:[#allocation20_spill]] %s1390_s2 }
   0x2   :  { %10 = vsyncpa [#allocation3], 0 }
   0x3   :  { %12 = vsyncpa [#allocation3 + $0x1], 0 }
   0x4   :  { %13 = vsyncpa [#allocation6], 0 }
   0x5   :  { %15 = vsyncpa [#allocation6 + $0x1], 0 }
   0x6   :  { %16 = vsyncpa [#allocation4], 0 }
   0x7   :  { %18 = vsyncpa [#allocation4 + $0x1], 0 }
   0x8   :  { %19 = vsyncpa [#allocation10], 0 }
   0x9   :  { %21 = vsyncpa [#allocation10 + $0x1], 0  ;;  %s1198_s15 = smov 0   ;;  %s1200_s16 = smov 0  }
   0xa   :  { %s1202_s17 = smov 0   ;;  %s1204_s18 = smov 0  }
   0xb   :  { %s1206_s19 = smov 0   ;;  %s1208_s20 = smov 0  }
   0xc LB: > { %1397 = sst [smem:[#allocation16_spill]] %s1155_s17  ;;  %s1229_s21 = sadd.s32 4294967295, %s1167_s20   ;;  %s1167_s20 = sphi %s1208_s20, %s27_s20   ;;  %s1163_s19 = sphi %s1206_s19, %s1410_s19   ;;  %s1159_s18 = sphi %s1204_s18, %s1409_s18   ;;  %s1155_s17 = sphi %s1202_s17, %s1408_s17   ;;  %s1151_s16 = sphi %s1200_s16, %s1412_s16   ;;  %s1147_s15 = sphi %s1198_s15, %s1411_s15  }
   0xd   : > { %1398 = sst [smem:[#allocation17_spill]] %s1163_s19  ;;  %p811_p0 = scmp.ge.s32.totalorder %s1167_s20, 1 }
   0xe   : > { %p62_p1 = scmp.eq.s32.totalorder %s1229_s21, 0  ;;  %p177_p2 = scmp.lt.s32.totalorder %s1167_s20, 3 }
   0xf   : > { %s1399_s2 = sld [smem:[#allocation20_spill]]  ;;  %s1169_s26 = smov [#allocation7]  }
  0x10   : > { %p1237_p3 = pnand %p811_p0, %p177_p2  ;;  %s190_s27 = sshll.u32 %s1169_s26, 4  ;;  %s191_s27 = int_to_ptr.vmem [resolvable:$true] %s190_s27 }
  0x11   : > { %p813_p6 = scmp.ge.s32.totalorder %s1167_s20, 2  ;;  %s1170_s28 = smov 768  }
  0x12   : > { %p878_p4 = pneg %p1237_p3  ;;  %s1171_s29 = smov 48  }
  0x13   : > { %s810_s30 = sadd.s32 4294967294, %s1167_s20   ;;  %s39_s5 = sadd.s32 1, %s1163_s19 }
  0x14   : > { %p879_p5 = pnand %p878_p4, %p62_p1  ;;  %s48_s6 = sadd.s32 1, %s1155_s17 }
  0x15   : > { %s188_s24 = sshll.u32 %s1399_s2, 4  ;;  %p41_p7 = scmp.ge.s32.totalorder %s39_s5, 2  ;;  %s189_s24 = int_to_ptr.hbm [resolvable:$true] %s188_s24 }
  0x16   : > { %881 = dma.hbm_to_vmem [thread:$0]  (!%p879_p5), %s189_s24, 3072, %s191_s27, [#allocation6], %s1170_s28, %s1170_s28, %s1171_s29  }
  0x17   : > { %p55_p8 = scmp.ne.s32.totalorder %s1155_s17, %s1151_s16  ;;  %p56_p9 = scmp.eq.s32.totalorder %s1167_s20, 0 }
  0x18   : > { %p61_p10 = scmp.ne.s32.totalorder %s1151_s16, %s1147_s15  ;;  %s1414_s5 = smov (%p41_p7, %s39_s5), 0 }
  0x19   : > { %1401 = sst [smem:[#allocation18_spill]] %s1414_s5  ;;  %p1256_p11 = por %p56_p9, %p55_p8 }
  0x1a   : > { %p1262_p12 = por %p62_p1, %p61_p10  ;;  %s43_s9 = ssub.s32 %s1163_s19, %s1414_s5 }
  0x1b   : > { %p136_p13 = scmp.eq.s32.totalorder %s1229_s21, 1  ;;  %p46_p0 = scmp.eq.s32.totalorder %s43_s9, 0 }
  0x1c   : > { %p142_p2 = scmp.eq.s32.totalorder %s810_s30, 1  ;;  %p897_p5 = scmp.lt.s32.totalorder %s1167_s20, 2 }
  0x1d   : > { %p1269_p4 = por %p136_p13, %p55_p8  ;;  %s204_s13 = sand.u32 1, %s1155_s17  }
  0x1e   : > { %s1275_s11 = scalar_select %p46_p0, %s1155_s17, %s48_s6  }
  0x1f   : > { %p1277_p7 = por %p142_p2, %p61_p10  ;;  %s814_s14 = sshll.u32 %s204_s13, 3 }
  0x20   : > { %1405 = sst [smem:[#allocation19_spill]] %s1275_s11  ;;  %s854_s22 = sshll.u32 %s1163_s19, 3 }
  0x21   : > { %s215_s26 = scalar_lea.hbm %s1388_s0, %s854_s22  ;;  %s208_s27 = scalar_lea.vmem [#allocation2], %s814_s14 }
  0x22   : > { %s219_s28 = sshll.u32 %s208_s27, 4  ;;  %s217_s29 = sshll.u32 %s215_s26, 4  ;;  %s220_s28 = int_to_ptr.vmem [resolvable:$true] %s219_s28  ;;  %s218_s29 = int_to_ptr.hbm [resolvable:$true] %s217_s29 }
  0x23   : > { %p883_p8 = pnand %p897_p5, %p1256_p11  ;;  %s237_s9 = scalar_lea.hbm %s1389_s1, %s854_s22 }
  0x24   : > { %s226_s2 = sand.u32 1, %s1167_s20   ;;  %s205_s5 = scalar_lea.sflag [#allocation3], %s204_s13 }
  0x25   : > { %885 = dma.hbm_to_vmem [thread:$0]  (!%p883_p8), %s218_s29, 128, %s220_s28, %s205_s5  }
  0x26   : > { %s239_s11 = sshll.u32 %s237_s9, 4  ;;  %s230_s19 = scalar_lea.vmem [#allocation5], %s814_s14  ;;  %s240_s11 = int_to_ptr.hbm [resolvable:$true] %s239_s11 }
  0x27   : > { %s241_s17 = sshll.u32 %s230_s19, 4  ;;  %s227_s23 = scalar_lea.sflag [#allocation6], %s226_s2  ;;  %s242_s17 = int_to_ptr.vmem [resolvable:$true] %s241_s17 }
  0x28   : > { %888 = dma.hbm_to_vmem [thread:$0]  (!%p883_p8), %s240_s11, 128, %s242_s17, %s227_s23  }
  0x29   : > { %250 = sbr.rel (%p1237_p3) target bundleno = 544 (0x220), region = 32  ;;  %s1295_s7 = sand.u32 (!%p1237_p3), 1, %s1151_s16  }
  0x2a   : > { %s821_s22 = sshll.u32 (!%p1237_p3), %s1295_s7, 3  ;;  %s253_s24 = scalar_lea.sflag (!%p1237_p3), [#allocation3], %s1295_s7 }
  0x2b   : > { %s256_s13 = scalar_lea.vmem (!%p1237_p3), [#allocation2], %s821_s22 }
  0x2e   : > { %1126 = dma.done.wait (%p1262_p12), %s253_s24, 128  }
  0x2f   : > { %1128 = vsyncadd (%p1262_p12), %s253_s24, 4294967168  ;;  %s262_s2 = sand.u32 1, %s1229_s21   ;;  %s266_s19 = scalar_lea.vmem [#allocation5], %s821_s22 }
  0x30   : > { %s263_s17 = scalar_lea.sflag [#allocation6], %s262_s2 }
  0x31   : > { %1130 = dma.done.wait (%p1262_p12), %s263_s17, 128  }
  0x32   : > { %1132 = vsyncadd (%p1262_p12), %s263_s17, 4294967168 }
  0x33   : > { %1134 = dma.done.wait (%p62_p1), [#allocation6], 3072  }
  0x34   : > { %1136 = vsyncadd (%p62_p1), [#allocation6], 4294964224  ;;  %v1172_v0 = vmov 0   ;;  %v331_v1 = vld [vmem:[%s256_s13] sm:$0xff]  ;;  %v316_v2 = vld [vmem:[#allocation7 + $0x38] sm:$0xff]  ;;  %vm346_vm0 = vcmask 1043456  }
  0x35   : > { %953 = vset.pattern.permute.xlu1 %v1172_v0  ;;  %952 = vset.pattern.permute.xlu0 %v1172_v0  ;;  %334 = vst [vmem:[#allocation1] ss:$2 sm:$0xff] %v331_v1  ;;  %v318_v3 = vld [vmem:[#allocation7 + $0x98] sm:$0xff]  ;;  %v315_v5 = vld [vmem:[#allocation7 + $0x8] sm:$0xff]  ;;  %v311_v9 = vld [vmem:[#allocation7] sm:$0xff]  ;;  %vm369_vm1 = vcmask 64512  }
  0x36   : > { %954 = vset.pattern.permute.xlu2 %v1172_v0  ;;  %356 = vperm.xlu1 %953, %v316_v2   ;;  %v332_v4 = vld [vmem:[%s266_s19] sm:$0xff]  ;;  %v317_v6 = vld [vmem:[#allocation7 + $0x68] sm:$0xff]  ;;  %v313_v18 = vld [vmem:[#allocation7 + $0x60] sm:$0xff]  ;;  %vm468_vm2 = vcmask 261120   ;;  %s856_s21 = sshll.u32 %s1159_s18, 4  ;;  %s824_s25 = sshll.u32 %s1295_s7, 4 }
  0x37   : > { %366 = vperm.xlu0 %952, %v318_v3   ;;  %v324_v14 = vld [vmem:[#allocation7 + $0x48] sm:$0xff]  ;;  %v323_v15 = vld [vmem:[#allocation7 + $0x18] sm:$0xff]  ;;  %v312_v16 = vld [vmem:[#allocation7 + $0x30] sm:$0xff]  ;;  %s632_s11 = scalar_lea.hbm %s1391_s3, %s856_s21  ;;  %s299_s14 = scalar_lea.vmem [#allocation8], %s824_s25 }
  0x38   : > { %v330_v17 = vld [vmem:[#allocation7 + $0x58] sm:$0xff]  ;;  %v314_v19 = vld [vmem:[#allocation7 + $0x90] sm:$0xff]  ;;  %v326_v40 = vld [vmem:[#allocation7 + $0xa8] sm:$0xff]  ;;  %s634_s26 = sshll.u32 %s299_s14, 4  ;;  %s636_s27 = sshll.u32 %s632_s11, 4  ;;  %s635_s26 = int_to_ptr.vmem [resolvable:$true] %s634_s26  ;;  %s637_s27 = int_to_ptr.hbm [resolvable:$true] %s636_s27 }
  0x39   : > { %465 = vperm.xlu2 %954, %v326_v40   ;;  %v319_v49 = vld [vmem:[#allocation7 + $0x10] sm:$0xff]  ;;  %v325_v50 = vld [vmem:[#allocation7 + $0x78] sm:$0xff]  ;;  %v320_v51 = vld [vmem:[#allocation7 + $0x40] sm:$0xff]  ;;  %s1340_s30 = scalar_lea.hbm %s1392_s4, %s856_s21  ;;  %s306_s18 = scalar_lea.vmem [#allocation9], %s824_s25 }
  0x3a   : > { %v329_v52 = vld [vmem:[#allocation7 + $0x28] sm:$0xff]  ;;  %v321_v53 = vld [vmem:[#allocation7 + $0x70] sm:$0xff]  ;;  %v322_v54 = vld [vmem:[#allocation7 + $0xa0] sm:$0xff]  ;;  %s651_s6 = sshll.u32 %s306_s18, 4  ;;  %s653_s9 = sshll.u32 %s1340_s30, 4  ;;  %s652_s6 = int_to_ptr.vmem [resolvable:$true] %s651_s6  ;;  %s654_s9 = int_to_ptr.hbm [resolvable:$true] %s653_s9 }
  0x3b   : > { %s614_s23 = scalar_lea.sflag [#allocation4], %s1295_s7  ;;  %s1059_s22 = sshra.s32 %s637_s27, 4  ;;  %s1060_s22 = int_to_ptr.hbm [resolvable:$true] %s1059_s22 }
  0x3c   : > { %v335_v7 = vld.sshfl [vmem:[#allocation1] sm:$0xff pattern:$0x75316420]  ;;  %v336_v8 = vld.sshfl [vmem:[#allocation1 + $0x8] sm:$0xff pattern:$0x75316420]  ;;  %p1066_p10 = scmp.lt.s32.totalorder %s1060_s22, %s1391_s3 }
  0x3d   : > { %341 = vst [vmem:[#allocation1 + $0x1] ss:$2 sm:$0xff] %v332_v4  ;;  %s1061_s24 = scalar_lea.hbm %s1060_s22, 16  ;;  %s1065_s17 = scalar_lea.hbm %s1391_s3, 32 }
  0x3e   : > { %351 = vperm.xlu1 %953, %v315_v5   ;;  %p1062_p1 = scmp.ne.s32.totalorder %s1060_s22, %s1061_s24  ;;  %p1067_p11 = scmp.lt.s32.totalorder %s1065_s17, %s1061_s24 }
  0x3f   : > { %361 = vperm.xlu0 %952, %v317_v6  }
  0x40   : > { %p1063_p3 = pnand %p1062_p1, %p1269_p4  ;;  %p1068_p12 = por %p1067_p11, %p1066_p10 }
  0x41   : > { %460 = vperm.xlu2 %954, %v325_v50  }
  0x42   : > { %p1064_p9 = pneg %p1063_p3 }
  0x44   : > { %v342_v10 = vld.sshfl [vmem:[#allocation1] sm:$0xff pattern:$0x75316420]  ;;  %v343_v11 = vld.sshfl [vmem:[#allocation1 + $0x8] sm:$0xff pattern:$0x75316420]  ;;  %p1069_p13 = pnand %p1068_p12, %p1064_p9 }
  0x45   : > { %v347_v12 = vsel %vm346_vm0, %v335_v7, %v342_v10  ;;  %v348_v13 = vsel %vm346_vm0, %v336_v8, %v343_v11 }
  0x46   : > { %397 = vmatpush.msra.mxu0 %v347_v12  ;;  %426 = vmatpush.msra.mxu1 %v348_v13 }
  0x47   : > { %826 = vmatmul.msk.f32.vlgmr.msra.gmra.mxu0 %vm369_vm1, %v311_v9  ;;  %830 = vmatmul.msk.f32.vlgmr.msra.gmra.mxu1 %vm369_vm1, %v311_v9 }
  0x48   : > { %455 = vperm.xlu0 %952, %v324_v14   ;;  %450 = vperm.xlu1 %953, %v323_v15  }
  0x49   : > { %549 = vperm.xlu2 %954, %v329_v52  }
  0x4f   : > { %827 = vmatmul.msk.f32.gmra.mxu0 %vm369_vm1, %v312_v16  ;;  %831 = vmatmul.msk.f32.gmra.mxu1 %vm369_vm1, %v312_v16 }
  0x50   : > { %554 = vperm.xlu0 %952, %v330_v17  }
  0x57   : > { %828 = vmatmul.msk.f32.gmra.mxu0 %vm369_vm1, %v313_v18  ;;  %832 = vmatmul.msk.f32.gmra.mxu1 %vm369_vm1, %v313_v18 }
  0x5f   : > { %829 = vmatmul.msk.f32.gmra.mxu0 %vm369_vm1, %v314_v19  ;;  %833 = vmatmul.msk.f32.gmra.mxu1 %vm369_vm1, %v314_v19  ;;  %v327_v19 = vld [vmem:[#allocation7 + $0x20] sm:$0xff] }
  0x93   : > { %v466_v59 = vpop.permute.xlu2 %465 }
  0x9b   : > { %v461_v62 = vpop.permute.xlu2 %460 }
  0xa8   : > { %v357_v25 = vpop.permute.xlu1 %356 }
  0xa9   : > { %v367_v24 = vpop.permute.xlu0 %366 }
  0xb0   : > { %v352_v35 = vpop.permute.xlu1 %351 }
  0xb1   : > { %v362_v28 = vpop.permute.xlu0 %361 }
  0xba   : > { %v456_v4 = vpop.permute.xlu0 %455  ;;  %v451_v9 = vpop.permute.xlu1 %450 }
  0xc4   : > { %v399_v20 = vpop.f32.mrf.mxu0  ;;  %v428_v21 = vpop.f32.mrf.mxu1 }
  0xc5   : > { %v400_v41 = vadd.f32 %v399_v20, %v352_v35  ;;  %v429_v42 = vadd.f32 %v428_v21, %v352_v35  ;;  %v328_v20 = vld [vmem:[#allocation7 + $0x50] sm:$0xff]  ;;  %v550_v21 = vpop.permute.xlu2 %549 }
  0xc7   : > { %v440_v47 = vmax.f32 %v400_v41, 0.0  ;;  %v441_v48 = vmax.f32 %v429_v42, 0.0 }
  0xcc   : > { %v402_v22 = vpop.f32.mrf.mxu0  ;;  %v431_v23 = vpop.f32.mrf.mxu1 }
  0xcd   : > { %v403_v36 = vadd.f32 %v402_v22, %v357_v25  ;;  %v432_v37 = vadd.f32 %v431_v23, %v357_v25 }
  0xcf   : > { %v442_v45 = vmax.f32 %v403_v36, 0.0  ;;  %v443_v46 = vmax.f32 %v432_v37, 0.0 }
  0xd4   : > { %v405_v26 = vpop.f32.mrf.mxu0  ;;  %v434_v27 = vpop.f32.mrf.mxu1 }
  0xd5   : > { %v406_v31 = vadd.f32 %v405_v26, %v362_v28  ;;  %v435_v32 = vadd.f32 %v434_v27, %v362_v28 }
  0xd7   : > { %v444_v43 = vmax.f32 %v406_v31, 0.0  ;;  %v445_v44 = vmax.f32 %v435_v32, 0.0 }
  0xdc   : > { %v408_v29 = vpop.f32.mrf.mxu0  ;;  %v437_v30 = vpop.f32.mrf.mxu1 }
  0xdd   : > { %v409_v33 = vadd.f32 %v408_v29, %v367_v24  ;;  %v438_v34 = vadd.f32 %v437_v30, %v367_v24 }
  0xdf   : > { %v446_v38 = vmax.f32 %v409_v33, 0.0  ;;  %v447_v39 = vmax.f32 %v438_v34, 0.0 }
  0xe1   : > { %493 = vmatpush.msra.mxu2 %v446_v38  ;;  %522 = vmatpush.msra.mxu3 %v447_v39 }
  0xe3   : > { %494 = vmatpush.msra.mxu2 %v444_v43  ;;  %523 = vmatpush.msra.mxu3 %v445_v44 }
  0xe5   : > { %495 = vmatpush.msra.mxu2 %v442_v45  ;;  %524 = vmatpush.msra.mxu3 %v443_v46 }
  0xe7   : > { %496 = vmatpush.msra.mxu2 %v440_v47  ;;  %525 = vmatpush.msra.mxu3 %v441_v48 }
  0xe8   : > { %834 = vmatmul.msk.f32.vlgmr.msra.gmra.mxu2 %vm468_vm2, %v319_v49  ;;  %838 = vmatmul.msk.f32.vlgmr.msra.gmra.mxu3 %vm468_vm2, %v319_v49 }
  0xf0   : > { %835 = vmatmul.msk.f32.gmra.mxu2 %vm468_vm2, %v320_v51  ;;  %839 = vmatmul.msk.f32.gmra.mxu3 %vm468_vm2, %v320_v51 }
  0xf8   : > { %836 = vmatmul.msk.f32.gmra.mxu2 %vm468_vm2, %v321_v53  ;;  %840 = vmatmul.msk.f32.gmra.mxu3 %vm468_vm2, %v321_v53 }
 0x100   : > { %837 = vmatmul.msk.f32.gmra.mxu2 %vm468_vm2, %v322_v54  ;;  %841 = vmatmul.msk.f32.gmra.mxu3 %vm468_vm2, %v322_v54 }
 0x16b   : > { %v498_v55 = vpop.f32.mrf.mxu2  ;;  %v527_v56 = vpop.f32.mrf.mxu3 }
 0x16c   : > { %v499_v11 = vadd.f32 %v498_v55, %v451_v9  ;;  %v528_v13 = vadd.f32 %v527_v56, %v451_v9 }
 0x16e   : > { %v539_v17 = vmax.f32 %v499_v11, 0.0  ;;  %v540_v18 = vmax.f32 %v528_v13, 0.0 }
 0x173   : > { %v501_v57 = vpop.f32.mrf.mxu2  ;;  %v530_v58 = vpop.f32.mrf.mxu3 }
 0x174   : > { %v502_v6 = vadd.f32 %v501_v57, %v456_v4  ;;  %v531_v10 = vadd.f32 %v530_v58, %v456_v4 }
 0x176   : > { %v541_v15 = vmax.f32 %v502_v6, 0.0  ;;  %v542_v16 = vmax.f32 %v531_v10, 0.0 }
 0x17b   : > { %v504_v60 = vpop.f32.mrf.mxu2  ;;  %v533_v61 = vpop.f32.mrf.mxu3 }
 0x17c   : > { %v505_v1 = vadd.f32 %v504_v60, %v461_v62  ;;  %v534_v5 = vadd.f32 %v533_v61, %v461_v62 }
 0x17e   : > { %v543_v12 = vmax.f32 %v505_v1, 0.0  ;;  %v544_v14 = vmax.f32 %v534_v5, 0.0 }
 0x183   : > { %v507_v63 = vpop.f32.mrf.mxu2  ;;  %v536_v0 = vpop.f32.mrf.mxu3 }
 0x184   : > { %v508_v2 = vadd.f32 %v507_v63, %v466_v59  ;;  %v537_v3 = vadd.f32 %v536_v0, %v466_v59 }
 0x186   : > { %v545_v7 = vmax.f32 %v508_v2, 0.0  ;;  %v546_v8 = vmax.f32 %v537_v3, 0.0 }
 0x188   : > { %575 = vmatpush.msrb.mxu0 %v545_v7  ;;  %858 = vmatpush.msrb.mxu2 %v545_v7 }
 0x189   : > { %598 = vmatpush.msrb.mxu1 %v546_v8  ;;  %862 = vmatpush.msrb.mxu3 %v546_v8 }
 0x18a   : > { %576 = vmatpush.msrb.mxu0 %v543_v12  ;;  %859 = vmatpush.msrb.mxu2 %v543_v12 }
 0x18b   : > { %599 = vmatpush.msrb.mxu1 %v544_v14  ;;  %863 = vmatpush.msrb.mxu3 %v544_v14 }
 0x18c   : > { %577 = vmatpush.msrb.mxu0 %v541_v15  ;;  %860 = vmatpush.msrb.mxu2 %v541_v15 }
 0x18d   : > { %600 = vmatpush.msrb.mxu1 %v542_v16  ;;  %864 = vmatpush.msrb.mxu3 %v542_v16 }
 0x18e   : > { %578 = vmatpush.msrb.mxu0 %v539_v17  ;;  %861 = vmatpush.msrb.mxu2 %v539_v17 }
 0x18f   : > { %601 = vmatpush.msrb.mxu1 %v540_v18  ;;  %865 = vmatpush.msrb.mxu3 %v540_v18 }
 0x190   : > { %842 = vmatmul.msk.f32.vlgmr.msrb.gmra.mxu0 %vm468_vm2, %v327_v19  ;;  %843 = vmatmul.msk.f32.vlgmr.msrb.gmra.mxu2 %vm468_vm2, %v328_v20 }
 0x191   : > { %844 = vmatmul.msk.f32.vlgmr.msrb.gmra.mxu1 %vm468_vm2, %v327_v19  ;;  %845 = vmatmul.msk.f32.vlgmr.msrb.gmra.mxu3 %vm468_vm2, %v328_v20 }
 0x20d   : > { %v580_v22 = vpop.f32.mrf.mxu0 }
 0x20e   : > { %v581_v23 = vadd.f32 %v580_v22, %v550_v21  ;;  %v603_v24 = vpop.f32.mrf.mxu1 }
 0x20f   : > { %v604_v25 = vadd.f32 %v603_v24, %v550_v21 }
 0x210   : > { %609 = vst [vmem:[%s299_s14] sm:$0xff] %v581_v23 }
 0x211   : > { %610 = vst [vmem:[%s299_s14 + $0x8] sm:$0xff] %v604_v25 }
 0x212   : > { %1072 = shalt.err (!%p1069_p13)
}
 0x213   : > { %874 = dma.vmem_to_hbm [thread:$0]  (%p1269_p4), %s635_s26, 256, %s637_s27, %s614_s23   ;;  %v555_v26 = vpop.permute.xlu0 %554  ;;  %v583_v27 = vpop.f32.mrf.mxu2 }
 0x214   : > { %v584_v28 = vadd.f32 %v583_v27, %v555_v26  ;;  %v606_v29 = vpop.f32.mrf.mxu3  ;;  %s619_s25 = scalar_lea.sflag [#allocation10], %s1295_s7  ;;  %s1087_s5 = sshra.s32 %s654_s9, 4  ;;  %s1088_s5 = int_to_ptr.hbm [resolvable:$true] %s1087_s5 }
 0x215   : > { %v607_v30 = vadd.f32 %v606_v29, %v555_v26  ;;  %s1089_s8 = scalar_lea.hbm %s1088_s5, 16  ;;  %s1093_s26 = scalar_lea.hbm %s1392_s4, 32 }
 0x216   : > { %611 = vst [vmem:[%s306_s18] sm:$0xff] %v584_v28  ;;  %p1090_p0 = scmp.ne.s32.totalorder %s1088_s5, %s1089_s8  ;;  %p1094_p8 = scmp.lt.s32.totalorder %s1088_s5, %s1392_s4 }
 0x217   : > { %612 = vst [vmem:[%s306_s18 + $0x8] sm:$0xff] %v607_v30  ;;  %p1095_p1 = scmp.lt.s32.totalorder %s1093_s26, %s1089_s8 }
 0x218   : > { %p1091_p2 = pnand %p1090_p0, %p1269_p4 }
 0x219   : > { %p1096_p3 = por %p1095_p1, %p1094_p8 }
 0x21a   : > { %p1092_p5 = pneg %p1091_p2 }
 0x21c   : > { %p1097_p9 = pnand %p1096_p3, %p1092_p5 }
 0x21e   : > { %1100 = shalt.err (!%p1097_p9)
}
 0x21f   : > { %875 = dma.vmem_to_hbm [thread:$0]  (%p1269_p4), %s652_s6, 256, %s654_s9, %s619_s25  }
 0x220 PF: > { %s665_s7 = sand.u32 1, %s1147_s15   ;;  %p890_p10 = pnand %p813_p6, %p1277_p7 }
 0x221   : > { %s666_s29 = scalar_lea.sflag [#allocation4], %s665_s7 }
 0x222   : > { %p891_p11 = pneg %p890_p10 }
 0x224   : > { %1138 = dma.done.wait (%p891_p11), %s666_s29, 256  }
 0x225   : > { %1140 = vsyncadd (%p891_p11), %s666_s29, 4294967040  ;;  %s676_s30 = scalar_lea.sflag [#allocation10], %s665_s7 }
 0x226   : > { %1142 = dma.done.wait (%p891_p11), %s676_s30, 256  }
 0x227   : > { %1144 = vsyncadd (%p891_p11), %s676_s30, 4294967040  ;;  %s27_s20 = sadd.s32 1, %s1167_s20   ;;  %s1407_s10 = sld [smem:[#allocation16_spill]] }
 0x228   : > { %p24_p12 = scmp.ge.s32.totalorder %s27_s20, 4   ;;  %s1408_s17 = sld [smem:[#allocation19_spill]] }
 0x229   : > { %s1409_s18 = sld [smem:[#allocation17_spill]]  ;;  %s1411_s15 = smov %s1151_s16 }
 0x22a   : > { %s1410_s19 = sld [smem:[#allocation18_spill]]  ;;  %26 = sbr.rel (!%p24_p12) target bundleno = 12 (0xc), region = 112 }
 0x22d   : > { %s1412_s16 = smov %s1407_s10 }
 0x22f   :  { %682 = vsyncpa [#allocation3], 1 }
 0x230   :  { %684 = vsyncpa [#allocation3 + $0x1], 1 }
 0x231   :  { %685 = vsyncpa [#allocation6], 1 }
 0x232   :  { %687 = vsyncpa [#allocation6 + $0x1], 1 }
 0x233   :  { %688 = vsyncpa [#allocation4], 1 }
 0x234   :  { %690 = vsyncpa [#allocation4 + $0x1], 1 }
 0x235   :  { %691 = vsyncpa [#allocation10], 1 }
 0x236   :  { %693 = vsyncpa [#allocation10 + $0x1], 1 }

</bundles_post_ra>
